<compile_context>
chip_gen: v7x
topology: tpu7x:2x2x1
jax: 0.10.0
libtpu: 0.0.40
codegen_flags: <defaults>
</compile_context>

<pallas_src>
import math
import functools

import jax
import jax.numpy as jnp
from jax import lax
from jax.experimental import pallas as pl
from jax.experimental.pallas import tpu as pltpu

# ---------------- model config (small, consistent with the module) ----------------
BATCH = 2
SEQ = 8
D_MODEL = 32
NUM_HEADS = 4
D_K = D_MODEL // NUM_HEADS


# ---------------------------------- Pallas kernel ----------------------------------
def _mha_kernel(q_ref, k_ref, v_ref, mask_ref,
                wq_ref, wk_ref, wv_ref, wo_ref, o_ref, *,
                batch, seq, num_heads, d_k):
    """Fused multi-head attention, whole batch in one invocation.

    q_ref/k_ref/v_ref : (B, S, D)      activations
    mask_ref          : (B, S, S)      int32, 0 == masked out (broadcast over heads)
    wq/wk/wv_ref      : (H, D, d_k)    per-head projection weights (already transposed)
    wo_ref            : (H, d_k, D)    Wo^T split per head (concat folded into epilogue)
    o_ref             : (B, S, D)
    """
    B, S, H, dk = batch, seq, num_heads, d_k
    D = H * dk
    BS = B * S
    G = H * B                      # group axis: g = h * B + b

    neg_big = jnp.float32(-1e9)
    inv_sqrt_dk = jnp.float32(1.0 / math.sqrt(dk))

    def project(x_ref, w_ref):
        """(B,S,D) @ (H,D,dk) -> (G,S,dk) per-(head,batch) groups, no transposes."""
        x2d = x_ref[...].reshape(BS, D)                      # leading-dim collapse: free
        xb = jnp.broadcast_to(x2d[None], (H, BS, D))         # tiny, leading-dim broadcast
        ph = lax.dot_general(                                # one batched MXU matmul
            xb, w_ref[...],
            dimension_numbers=(((2,), (1,)), ((0,), (0,))),
            preferred_element_type=jnp.float32)              # (H, BS, dk)
        return ph.reshape(G, S, dk)                          # g = h*B + b

    q_g = project(q_ref, wq_ref)
    k_g = project(k_ref, wk_ref)
    v_g = project(v_ref, wv_ref)

    # --- scaled attention scores for all (head, batch) groups: one batched dot.
    scores = jnp.einsum("gqd,gkd->gqk", q_g, k_g,
                        preferred_element_type=jnp.float32) * inv_sqrt_dk   # (G,S,S)

    # --- masked_fill_(mask == 0, -1e9); mask broadcasts over heads (no per-head stack).
    m_g = jnp.broadcast_to(mask_ref[...][None], (H, B, S, S)).reshape(G, S, S)
    scores = jnp.where(m_g == 0, neg_big, scores)

    # --- numerically-stable softmax; exact division (kernel is not EUP-bound).
    scores = scores - jnp.max(scores, axis=-1, keepdims=True)
    p = jnp.exp(scores)
    attn = p / jnp.sum(p, axis=-1, keepdims=True)
    # TODO(synk): nn.Dropout(p) on `attn` is treated as p=0 / eval mode (identity).

    # --- per-head context for all groups: one batched dot.
    ctx = jnp.einsum("gqk,gkd->gqd", attn, v_g,
                     preferred_element_type=jnp.float32)                    # (G,S,dk)

    # --- head concat folded into the output projection: contract d_k per head with
    #     Wo^T laid out (H, d_k, D), then sum partial outputs over heads.
    part = lax.dot_general(
        ctx.reshape(H, BS, dk), wo_ref[...],
        dimension_numbers=(((2,), (1,)), ((0,), (0,))),
        preferred_element_type=jnp.float32)                                 # (H, BS, D)
    out2d = jnp.sum(part, axis=0)                                           # (BS, D)

    o_ref[...] = out2d.reshape(B, S, D).astype(o_ref.dtype)


# ----------------------- one-time preprocessing (hoisted) --------------------------
def prepare_weights(wq, wk, wv, wo, *, num_heads):
    """Torch nn.Linear weights (out, in) -> per-head kernel layouts. Call once."""
    d_model = wq.shape[0]
    d_k = d_model // num_heads

    def per_head_in(w):                     # x @ w.T, output columns split per head
        return w.T.reshape(d_model, num_heads, d_k).transpose(1, 0, 2)   # (H, D, d_k)

    wo_heads = wo.T.reshape(num_heads, d_k, d_model)                      # (H, d_k, D)
    return per_head_in(wq), per_head_in(wk), per_head_in(wv), wo_heads


def prepare_mask(mask, *, batch, seq):
    """(B,1,S,S)-broadcastable mask -> compact (B,S,S) int32. Call once.

    int32 kept on purpose: the mask is 128 elements, so int8/bool saves nothing
    measurable while int32 compares have the most robust Mosaic lowering.
    """
    m = jnp.broadcast_to(mask, (batch, 1, seq, seq)).reshape(batch, seq, seq)
    return m.astype(jnp.int32)


# ---------------------------------- wrapper ----------------------------------------
@functools.partial(jax.jit, static_argnames=("num_heads",))
def multi_head_attention(q, k, v, mask3, wq_h, wk_h, wv_h, wo_h, *, num_heads):
    """q,k,v: (B,S,D); mask3: (B,S,S) int32; w*_h: pre-packed per-head weights."""
    B, S, D = q.shape
    d_k = D // num_heads

    kernel = functools.partial(_mha_kernel, batch=B, seq=S,
                               num_heads=num_heads, d_k=d_k)

    vmem = lambda: pl.BlockSpec(memory_space=pltpu.MemorySpace.VMEM)

    # Whole problem is a few KB -> single invocation (empty grid), whole-array VMEM
    # blocks.  At real sizes: add a parallel B (or B*H) grid axis (v7x has 2 TCs),
    # flash-style KV tiling, bf16 MXU operands, and lane-dense (>=128) output blocks.
    return pl.pallas_call(
        kernel,
        out_shape=jax.ShapeDtypeStruct((B, S, D), q.dtype),
        in_specs=[vmem() for _ in range(8)],
        out_specs=vmem(),
    )(q, k, v, mask3, wq_h, wk_h, wv_h, wo_h)


# -------------------------- pure-JAX reference (for sanity) ------------------------
def reference_mha(q, k, v, mask, wq, wk, wv, wo, *, num_heads):
    B, S, D = q.shape
    d_k = D // num_heads
    hp = jax.lax.Precision.HIGHEST

    def split(x):  # (B,S,D) -> (B,h,S,d_k)
        return x.reshape(B, S, num_heads, d_k).transpose(0, 2, 1, 3)

    Q = split(jnp.matmul(q, wq.T, precision=hp))
    K = split(jnp.matmul(k, wk.T, precision=hp))
    V = split(jnp.matmul(v, wv.T, precision=hp))
    scores = jnp.einsum("bhqd,bhkd->bhqk", Q, K, precision=hp) / math.sqrt(d_k)
    scores = jnp.where(mask == 0, -1e9, scores)
    attn = jax.nn.softmax(scores, axis=-1)
    out = jnp.einsum("bhqk,bhkd->bhqd", attn, V, precision=hp)
    out = out.transpose(0, 2, 1, 3).reshape(B, S, D)
    return jnp.matmul(out, wo.T, precision=hp)


# ------------------------------------- main -----------------------------------------
if __name__ == "__main__":
    key = jax.random.PRNGKey(0)
    kq, kk, kv, kwq, kwk, kwv, kwo, kmask = jax.random.split(key, 8)

    q = jax.random.normal(kq, (BATCH, SEQ, D_MODEL), dtype=jnp.float32)
    k = jax.random.normal(kk, (BATCH, SEQ, D_MODEL), dtype=jnp.float32)
    v = jax.random.normal(kv, (BATCH, SEQ, D_MODEL), dtype=jnp.float32)

    # Deterministic Linear weights, shape (out_features, in_features) like torch.
    scale = 1.0 / math.sqrt(D_MODEL)
    wq = jax.random.uniform(kwq, (D_MODEL, D_MODEL), jnp.float32, -scale, scale)
    wk = jax.random.uniform(kwk, (D_MODEL, D_MODEL), jnp.float32, -scale, scale)
    wv = jax.random.uniform(kwv, (D_MODEL, D_MODEL), jnp.float32, -scale, scale)
    wo = jax.random.uniform(kwo, (D_MODEL, D_MODEL), jnp.float32, -scale, scale)

    # Padding-style mask: (B, 1, S, S), zeros mean "masked out".
    mask = (jax.random.uniform(kmask, (BATCH, 1, 1, SEQ)) > 0.2).astype(jnp.int32)
    mask = jnp.broadcast_to(mask, (BATCH, 1, SEQ, SEQ))

    # One-time preprocessing, hoisted out of the per-call path.
    wq_h, wk_h, wv_h, wo_h = prepare_weights(wq, wk, wv, wo, num_heads=NUM_HEADS)
    mask3 = prepare_mask(mask, batch=BATCH, seq=SEQ)

    out = multi_head_attention(q, k, v, mask3, wq_h, wk_h, wv_h, wo_h,
                               num_heads=NUM_HEADS)
    out = jax.block_until_ready(out)

    ref = reference_mha(q, k, v, mask, wq, wk, wv, wo, num_heads=NUM_HEADS)
    assert out.shape == (BATCH, SEQ, D_MODEL)
    # Exact-division softmax (no approx reciprocal) -> tight tolerance again.
    assert jnp.allclose(out, ref, atol=1e-4, rtol=1e-4), "mismatch vs JAX reference"

    print("KERNEL_OK")
</pallas_src>

<mosaic_0001>
module attributes {stable_mosaic.version = 11 : i64} {
  func.func @_mha_kernel(%arg0: memref<2x8x32xf32, #tpu.memory_space<vmem>>, %arg1: memref<2x8x32xf32, #tpu.memory_space<vmem>>, %arg2: memref<2x8x32xf32, #tpu.memory_space<vmem>>, %arg3: memref<2x8x8xi32, #tpu.memory_space<vmem>>, %arg4: memref<4x32x8xf32, #tpu.memory_space<vmem>>, %arg5: memref<4x32x8xf32, #tpu.memory_space<vmem>>, %arg6: memref<4x32x8xf32, #tpu.memory_space<vmem>>, %arg7: memref<4x8x32xf32, #tpu.memory_space<vmem>>, %arg8: memref<2x8x32xf32, #tpu.memory_space<vmem>>) attributes {dimension_semantics = [], scalar_prefetch = 0 : i64, scratch_operands = 0 : i64, tpu.core_type = #tpu.core_type<tc>} {
    %c0 = arith.constant 0 : index
    %c0_0 = arith.constant 0 : index
    %c0_1 = arith.constant 0 : index
    %0 = vector.load %arg0[%c0, %c0_0, %c0_1] : memref<2x8x32xf32, #tpu.memory_space<vmem>>, vector<2x8x32xf32>
    %1 = vector.shape_cast %0 : vector<2x8x32xf32> to vector<16x32xf32>
    %2 = vector.shape_cast %1 : vector<16x32xf32> to vector<1x16x32xf32>
    %3 = vector.shape_cast %2 : vector<1x16x32xf32> to vector<1x16x32xf32>
    %4 = vector.broadcast %3 : vector<1x16x32xf32> to vector<4x16x32xf32>
    %c0_2 = arith.constant 0 : index
    %c0_3 = arith.constant 0 : index
    %c0_4 = arith.constant 0 : index
    %5 = vector.load %arg4[%c0_2, %c0_3, %c0_4] : memref<4x32x8xf32, #tpu.memory_space<vmem>>, vector<4x32x8xf32>
    %cst = arith.constant dense<0.000000e+00> : vector<4x16x8xf32>
    %6 = tpu.matmul %4, %5, %cst {dimension_numbers = #tpu.dot_dimension_numbers<[2], [1], [1], [2], [0, 0, 0, 1, 1, 2], [0], [0]>} : vector<4x16x32xf32>, vector<4x32x8xf32>, vector<4x16x8xf32> -> vector<4x16x8xf32>
    %7 = vector.shape_cast %6 : vector<4x16x8xf32> to vector<8x8x8xf32>
    %c0_5 = arith.constant 0 : index
    %c0_6 = arith.constant 0 : index
    %c0_7 = arith.constant 0 : index
    %8 = vector.load %arg1[%c0_5, %c0_6, %c0_7] : memref<2x8x32xf32, #tpu.memory_space<vmem>>, vector<2x8x32xf32>
    %9 = vector.shape_cast %8 : vector<2x8x32xf32> to vector<16x32xf32>
    %10 = vector.shape_cast %9 : vector<16x32xf32> to vector<1x16x32xf32>
    %11 = vector.shape_cast %10 : vector<1x16x32xf32> to vector<1x16x32xf32>
    %12 = vector.broadcast %11 : vector<1x16x32xf32> to vector<4x16x32xf32>
    %c0_8 = arith.constant 0 : index
    %c0_9 = arith.constant 0 : index
    %c0_10 = arith.constant 0 : index
    %13 = vector.load %arg5[%c0_8, %c0_9, %c0_10] : memref<4x32x8xf32, #tpu.memory_space<vmem>>, vector<4x32x8xf32>
    %cst_11 = arith.constant dense<0.000000e+00> : vector<4x16x8xf32>
    %14 = tpu.matmul %12, %13, %cst_11 {dimension_numbers = #tpu.dot_dimension_numbers<[2], [1], [1], [2], [0, 0, 0, 1, 1, 2], [0], [0]>} : vector<4x16x32xf32>, vector<4x32x8xf32>, vector<4x16x8xf32> -> vector<4x16x8xf32>
    %15 = vector.shape_cast %14 : vector<4x16x8xf32> to vector<8x8x8xf32>
    %c0_12 = arith.constant 0 : index
    %c0_13 = arith.constant 0 : index
    %c0_14 = arith.constant 0 : index
    %16 = vector.load %arg2[%c0_12, %c0_13, %c0_14] : memref<2x8x32xf32, #tpu.memory_space<vmem>>, vector<2x8x32xf32>
    %17 = vector.shape_cast %16 : vector<2x8x32xf32> to vector<16x32xf32>
    %18 = vector.shape_cast %17 : vector<16x32xf32> to vector<1x16x32xf32>
    %19 = vector.shape_cast %18 : vector<1x16x32xf32> to vector<1x16x32xf32>
    %20 = vector.broadcast %19 : vector<1x16x32xf32> to vector<4x16x32xf32>
    %c0_15 = arith.constant 0 : index
    %c0_16 = arith.constant 0 : index
    %c0_17 = arith.constant 0 : index
    %21 = vector.load %arg6[%c0_15, %c0_16, %c0_17] : memref<4x32x8xf32, #tpu.memory_space<vmem>>, vector<4x32x8xf32>
    %cst_18 = arith.constant dense<0.000000e+00> : vector<4x16x8xf32>
    %22 = tpu.matmul %20, %21, %cst_18 {dimension_numbers = #tpu.dot_dimension_numbers<[2], [1], [1], [2], [0, 0, 0, 1, 1, 2], [0], [0]>} : vector<4x16x32xf32>, vector<4x32x8xf32>, vector<4x16x8xf32> -> vector<4x16x8xf32>
    %23 = vector.shape_cast %22 : vector<4x16x8xf32> to vector<8x8x8xf32>
    "tpu.trace_start"() <{level = 10 : i32, message = "gqd,gkd->gqk"}> : () -> ()
    %cst_19 = arith.constant dense<0.000000e+00> : vector<8x8x8xf32>
    %24 = tpu.matmul %7, %15, %cst_19 {dimension_numbers = #tpu.dot_dimension_numbers<[2], [2], [1], [1], [0, 0, 0, 1, 1, 1], [0], [0]>} : vector<8x8x8xf32>, vector<8x8x8xf32>, vector<8x8x8xf32> -> vector<8x8x8xf32>
    "tpu.trace_stop"() : () -> ()
    %cst_20 = arith.constant 0.353553385 : f32
    %25 = vector.broadcast %cst_20 : f32 to vector<8x8x8xf32>
    %26 = arith.mulf %24, %25 : vector<8x8x8xf32>
    %c0_21 = arith.constant 0 : index
    %c0_22 = arith.constant 0 : index
    %c0_23 = arith.constant 0 : index
    %27 = vector.load %arg3[%c0_21, %c0_22, %c0_23] : memref<2x8x8xi32, #tpu.memory_space<vmem>>, vector<2x8x8xi32>
    %28 = vector.shape_cast %27 : vector<2x8x8xi32> to vector<1x2x8x8xi32>
    %29 = vector.shape_cast %28 : vector<1x2x8x8xi32> to vector<1x2x8x8xi32>
    %30 = vector.broadcast %29 : vector<1x2x8x8xi32> to vector<4x2x8x8xi32>
    %31 = vector.shape_cast %30 : vector<4x2x8x8xi32> to vector<8x8x8xi32>
    %c0_i32 = arith.constant 0 : i32
    %32 = vector.broadcast %c0_i32 : i32 to vector<8x8x8xi32>
    %33 = arith.cmpi eq, %31, %32 : vector<8x8x8xi32>
    %cst_24 = arith.constant -1.000000e+09 : f32
    %34 = vector.broadcast %cst_24 : f32 to vector<8x8x8xf32>
    %35 = arith.select %33, %34, %26 : vector<8x8x8xi1>, vector<8x8x8xf32>
    %cst_25 = arith.constant dense<0xFF800000> : vector<8x8xf32>
    %36 = vector.multi_reduction <maximumf>, %35, %cst_25 [2] : vector<8x8x8xf32> to vector<8x8xf32>
    %37 = vector.shape_cast %36 : vector<8x8xf32> to vector<8x8x1xf32>
    %38 = vector.broadcast %37 : vector<8x8x1xf32> to vector<8x8x8xf32>
    %39 = arith.subf %35, %38 : vector<8x8x8xf32>
    %40 = math.exp %39 : vector<8x8x8xf32>
    %cst_26 = arith.constant dense<0.000000e+00> : vector<8x8xf32>
    %41 = vector.multi_reduction <add>, %40, %cst_26 [2] : vector<8x8x8xf32> to vector<8x8xf32>
    %42 = vector.shape_cast %41 : vector<8x8xf32> to vector<8x8x1xf32>
    %43 = vector.broadcast %42 : vector<8x8x1xf32> to vector<8x8x8xf32>
    %44 = arith.divf %40, %43 : vector<8x8x8xf32>
    "tpu.trace_start"() <{level = 10 : i32, message = "gqk,gkd->gqd"}> : () -> ()
    %cst_27 = arith.constant dense<0.000000e+00> : vector<8x8x8xf32>
    %45 = tpu.matmul %44, %23, %cst_27 {dimension_numbers = #tpu.dot_dimension_numbers<[2], [1], [1], [2], [0, 0, 0, 1, 1, 2], [0], [0]>} : vector<8x8x8xf32>, vector<8x8x8xf32>, vector<8x8x8xf32> -> vector<8x8x8xf32>
    "tpu.trace_stop"() : () -> ()
    %46 = vector.shape_cast %45 : vector<8x8x8xf32> to vector<4x16x8xf32>
    %c0_28 = arith.constant 0 : index
    %c0_29 = arith.constant 0 : index
    %c0_30 = arith.constant 0 : index
    %47 = vector.load %arg7[%c0_28, %c0_29, %c0_30] : memref<4x8x32xf32, #tpu.memory_space<vmem>>, vector<4x8x32xf32>
    %cst_31 = arith.constant dense<0.000000e+00> : vector<4x16x32xf32>
    %48 = tpu.matmul %46, %47, %cst_31 {dimension_numbers = #tpu.dot_dimension_numbers<[2], [1], [1], [2], [0, 0, 0, 1, 1, 2], [0], [0]>} : vector<4x16x8xf32>, vector<4x8x32xf32>, vector<4x16x32xf32> -> vector<4x16x32xf32>
    %cst_32 = arith.constant dense<0.000000e+00> : vector<16x32xf32>
    %49 = vector.multi_reduction <add>, %48, %cst_32 [0] : vector<4x16x32xf32> to vector<16x32xf32>
    %50 = vector.shape_cast %49 : vector<16x32xf32> to vector<2x8x32xf32>
    %c0_33 = arith.constant 0 : index
    %c0_34 = arith.constant 0 : index
    %c0_35 = arith.constant 0 : index
    %51 = vector.load %arg8[%c0_33, %c0_34, %c0_35] : memref<2x8x32xf32, #tpu.memory_space<vmem>>, vector<2x8x32xf32>
    tpu.vector_store %arg8[%c0_33, %c0_34, %c0_35], %50 {strides = array<i32>} : memref<2x8x32xf32, #tpu.memory_space<vmem>>, vector<2x8x32xf32>,
    return
  }
}

</mosaic_0001>

<bundles_post_ra>
// kernel: multi_head_attention.1
= control target key start
LH: loop header
LB: loop body
LE: loop exit
PB: predicated region body
PF: predicated region fallthrough
CT: control target
= control target key end

     0   :  { %vm48_vm0 = vcmask 261120   ;;  %s3623_s0 = inlined_call_operand.vmem [shape: f32[2,8,32], index: 0, kind: input, shape index: {}]   ;;  %s3624_s1 = inlined_call_operand.vmem [shape: f32[2,8,32], index: 1, kind: input, shape index: {}]   ;;  %s3625_s2 = inlined_call_operand.vmem [shape: f32[2,8,32], index: 2, kind: input, shape index: {}]   ;;  %s3626_s3 = inlined_call_operand.vmem [shape: s32[2,8,8], index: 3, kind: input, shape index: {}]   ;;  %s3627_s4 = inlined_call_operand.vmem [shape: f32[4,32,8], index: 4, kind: input, shape index: {}]   ;;  %s3628_s5 = inlined_call_operand.vmem [shape: f32[4,32,8], index: 5, kind: input, shape index: {}]   ;;  %s3629_s6 = inlined_call_operand.vmem [shape: f32[4,32,8], index: 6, kind: input, shape index: {}]   ;;  %s3630_s7 = inlined_call_operand.vmem [shape: f32[4,8,32], index: 7, kind: input, shape index: {}]   ;;  %s3631_s8 = inlined_call_operand.hbm [shape: f32[2,8,32], index: 8, kind: output, shape index: {}]  }
   0x1   :  { %v32_v0 = vld [vmem:[%s3627_s4] sm:$0xff]  ;;  %v33_v1 = vld [vmem:[%s3627_s4 + $0x8] sm:$0xff]  ;;  %v34_v5 = vld [vmem:[%s3627_s4 + $0x10] sm:$0xff] }
   0x2   :  { %v36_v2 = vld [vmem:[%s3627_s4 + $0x20] sm:$0xff]  ;;  %v3068_v3 = vpack.c.bf16 %v33_v1, %v32_v0  ;;  %v37_v4 = vld [vmem:[%s3627_s4 + $0x28] sm:$0xff]  ;;  %v35_v6 = vld [vmem:[%s3627_s4 + $0x18] sm:$0xff] }
   0x3   :  { %v3076_v7 = vpack.c.bf16 %v37_v4, %v36_v2  ;;  %v3072_v8 = vpack.c.bf16 %v35_v6, %v34_v5  ;;  %v30_v9 = vld [vmem:[%s3623_s0] sm:$0xff]  ;;  %v38_v10 = vld [vmem:[%s3627_s4 + $0x30] sm:$0xff]  ;;  %v39_v11 = vld [vmem:[%s3627_s4 + $0x38] sm:$0xff] }
   0x4   :  { %3069 = vmatprep.subr.bf16.mxu0 %v3068_v3  ;;  %2844 = vmatprep.mubr.msk.f32.mxu0 %vm48_vm0, %v30_v9  ;;  %v3080_v12 = vpack.c.bf16 %v39_v11, %v38_v10  ;;  %v40_v13 = vld [vmem:[%s3627_s4 + $0x40] sm:$0xff]  ;;  %v41_v14 = vld [vmem:[%s3627_s4 + $0x48] sm:$0xff]  ;;  %v42_v19 = vld [vmem:[%s3627_s4 + $0x50] sm:$0xff] }
   0x5   :  { %3071 = vmatpush3.bf16.msra.mxu0 %v3068_v3  ;;  %3077 = vmatprep.subr.bf16.mxu1 %v3076_v7  ;;  %v44_v15 = vld [vmem:[%s3627_s4 + $0x60] sm:$0xff]  ;;  %v45_v16 = vld [vmem:[%s3627_s4 + $0x68] sm:$0xff]  ;;  %v3084_v17 = vpack.c.bf16 %v41_v14, %v40_v13  ;;  %v43_v20 = vld [vmem:[%s3627_s4 + $0x58] sm:$0xff] }
   0x6   :  { %3073 = vmatprep.subr.bf16.mxu0 %v3072_v8  ;;  %3079 = vmatpush3.bf16.msra.mxu1 %v3076_v7  ;;  %v3092_v18 = vpack.c.bf16 %v45_v16, %v44_v15  ;;  %v46_v21 = vld [vmem:[%s3627_s4 + $0x70] sm:$0xff]  ;;  %v47_v22 = vld [vmem:[%s3627_s4 + $0x78] sm:$0xff]  ;;  %v31_v23 = vld [vmem:[%s3623_s0 + $0x8] sm:$0xff]  ;;  %v3088_v24 = vpack.c.bf16 %v43_v20, %v42_v19 }
   0x7   :  { %3081 = vmatprep.subr.bf16.mxu1 %v3080_v12  ;;  %2855 = vmatprep.mubr.msk.f32.mxu1 %vm48_vm0, %v30_v9  ;;  %v3096_v25 = vpack.c.bf16 %v47_v22, %v46_v21  ;;  %v357_v26 = vld [vmem:[%s3628_s5] sm:$0xff]  ;;  %v358_v27 = vld [vmem:[%s3628_s5 + $0x8] sm:$0xff]  ;;  %v359_v32 = vld [vmem:[%s3628_s5 + $0x10] sm:$0xff] }
   0x8   :  { %v361_v28 = vld [vmem:[%s3628_s5 + $0x20] sm:$0xff]  ;;  %v362_v29 = vld [vmem:[%s3628_s5 + $0x28] sm:$0xff]  ;;  %v3100_v30 = vpack.c.bf16 %v358_v27, %v357_v26  ;;  %v360_v33 = vld [vmem:[%s3628_s5 + $0x18] sm:$0xff] }
   0x9   :  { %3075 = vmatpush3.bf16.msra.mxu0 %v3072_v8  ;;  %v3108_v31 = vpack.c.bf16 %v362_v29, %v361_v28 }
   0xa   :  { %3083 = vmatpush3.bf16.msra.mxu1 %v3080_v12  ;;  %3085 = vmatprep.subr.bf16.mxu0 %v3084_v17 }
   0xb   :  { %3093 = vmatprep.subr.bf16.mxu1 %v3092_v18 }
   0xc   :  { %2845 = vmatmul.mubr.msk.f32.vlgmr.msra.gmra.mrb[0].mxu0 %vm48_vm0, %v31_v23 }
   0xd   :  { %3087 = vmatpush3.bf16.msra.mxu0 %v3084_v17  ;;  %2856 = vmatmul.mubr.msk.f32.vlgmr.msra.gmra.mrb[0].mxu1 %vm48_vm0, %v31_v23 }
   0xe   :  { %3089 = vmatprep.subr.bf16.mxu0 %v3088_v24  ;;  %3095 = vmatpush3.bf16.msra.mxu1 %v3092_v18 }
   0xf   :  { %2866 = vmatprep.mubr.msk.f32.mxu0 %vm48_vm0, %v30_v9  ;;  %3097 = vmatprep.subr.bf16.mxu1 %v3096_v25 }
  0x10   :  { %13 = vsyncpa [#allocation3], 0  ;;  %2877 = vmatprep.mubr.msk.f32.mxu1 %vm48_vm0, %v30_v9  ;;  %v363_v34 = vld [vmem:[%s3628_s5 + $0x30] sm:$0xff]  ;;  %v364_v35 = vld [vmem:[%s3628_s5 + $0x38] sm:$0xff]  ;;  %v3104_v36 = vpack.c.bf16 %v360_v33, %v359_v32  ;;  %v3225_v14 = vmov 0.0   ;;  %vm3226_vm1 = vmmov 0  }
  0x11   :  { %3091 = vmatpush3.bf16.msra.mxu0 %v3088_v24  ;;  %v3112_v37 = vpack.c.bf16 %v364_v35, %v363_v34  ;;  %v365_v38 = vld [vmem:[%s3628_s5 + $0x40] sm:$0xff]  ;;  %v366_v39 = vld [vmem:[%s3628_s5 + $0x48] sm:$0xff]  ;;  %v367_v44 = vld [vmem:[%s3628_s5 + $0x50] sm:$0xff]  ;;  %vm1003_vm2 = vcmask 64512  }
  0x12   :  { %3099 = vmatpush3.bf16.msra.mxu1 %v3096_v25  ;;  %3101 = vmatprep.subr.bf16.mxu0 %v3100_v30  ;;  %v355_v40 = vld [vmem:[%s3624_s1] sm:$0xff]  ;;  %v370_v42 = vld [vmem:[%s3628_s5 + $0x68] sm:$0xff]  ;;  %v3116_v43 = vpack.c.bf16 %v366_v39, %v365_v38  ;;  %v368_v45 = vld [vmem:[%s3628_s5 + $0x58] sm:$0xff] }
  0x13   :  { %3109 = vmatprep.subr.bf16.mxu1 %v3108_v31  ;;  %v369_v41 = vld [vmem:[%s3628_s5 + $0x60] sm:$0xff]  ;;  %v371_v47 = vld [vmem:[%s3628_s5 + $0x70] sm:$0xff]  ;;  %v372_v48 = vld [vmem:[%s3628_s5 + $0x78] sm:$0xff]  ;;  %v3120_v50 = vpack.c.bf16 %v368_v45, %v367_v44 }
  0x14   :  { %2867 = vmatmul.mubr.msk.f32.vlgmr.msra.gmra.mrb[2].mxu0 %vm48_vm0, %v31_v23  ;;  %v3124_v46 = vpack.c.bf16 %v370_v42, %v369_v41  ;;  %v356_v49 = vld [vmem:[%s3624_s1 + $0x8] sm:$0xff]  ;;  %v3128_v51 = vpack.c.bf16 %v372_v48, %v371_v47  ;;  %v681_v52 = vld [vmem:[%s3629_s6] sm:$0xff]  ;;  %v687_v58 = vld [vmem:[%s3629_s6 + $0x30] sm:$0xff] }
  0x15   :  { %3103 = vmatpush3.bf16.msra.mxu0 %v3100_v30  ;;  %2878 = vmatmul.mubr.msk.f32.vlgmr.msra.gmra.mrb[2].mxu1 %vm48_vm0, %v31_v23  ;;  %v682_v53 = vld [vmem:[%s3629_s6 + $0x8] sm:$0xff]  ;;  %v685_v54 = vld [vmem:[%s3629_s6 + $0x20] sm:$0xff]  ;;  %v688_v59 = vld [vmem:[%s3629_s6 + $0x38] sm:$0xff] }
  0x16   :  { %3105 = vmatprep.subr.bf16.mxu0 %v3104_v36  ;;  %3111 = vmatpush3.bf16.msra.mxu1 %v3108_v31  ;;  %v686_v55 = vld [vmem:[%s3629_s6 + $0x28] sm:$0xff]  ;;  %v3132_v56 = vpack.c.bf16 %v682_v53, %v681_v52  ;;  %v3144_v60 = vpack.c.bf16 %v688_v59, %v687_v58  ;;  %v683_v61 = vld [vmem:[%s3629_s6 + $0x10] sm:$0xff]  ;;  %v684_v62 = vld [vmem:[%s3629_s6 + $0x18] sm:$0xff] }
  0x17   :  { %2888 = vmatprep.mubr.msk.f32.mxu0 %vm48_vm0, %v355_v40  ;;  %3113 = vmatprep.subr.bf16.mxu1 %v3112_v37  ;;  %v3140_v57 = vpack.c.bf16 %v686_v55, %v685_v54  ;;  %v3136_v63 = vpack.c.bf16 %v684_v62, %v683_v61  ;;  %v693_v0 = vld [vmem:[%s3629_s6 + $0x60] sm:$0xff]  ;;  %v694_v1 = vld [vmem:[%s3629_s6 + $0x68] sm:$0xff]  ;;  %v695_v7 = vld [vmem:[%s3629_s6 + $0x70] sm:$0xff] }
  0x18   :  { %2899 = vmatprep.mubr.msk.f32.mxu1 %vm48_vm0, %v355_v40  ;;  %v679_v2 = vld [vmem:[%s3625_s2] sm:$0xff]  ;;  %v3156_v3 = vpack.c.bf16 %v694_v1, %v693_v0  ;;  %v680_v4 = vld [vmem:[%s3625_s2 + $0x8] sm:$0xff]  ;;  %v696_v8 = vld [vmem:[%s3629_s6 + $0x78] sm:$0xff] }
  0x19   :  { %3107 = vmatpush3.bf16.msra.mxu0 %v3104_v36  ;;  %v689_v5 = vld [vmem:[%s3629_s6 + $0x40] sm:$0xff]  ;;  %v690_v6 = vld [vmem:[%s3629_s6 + $0x48] sm:$0xff]  ;;  %v3160_v10 = vpack.c.bf16 %v696_v8, %v695_v7  ;;  %v691_v11 = vld [vmem:[%s3629_s6 + $0x50] sm:$0xff] }
  0x1a   :  { %3115 = vmatpush3.bf16.msra.mxu1 %v3112_v37  ;;  %3117 = vmatprep.subr.bf16.mxu0 %v3116_v43  ;;  %v3148_v9 = vpack.c.bf16 %v690_v6, %v689_v5  ;;  %v692_v12 = vld [vmem:[%s3629_s6 + $0x58] sm:$0xff]  ;;  %v1620_v39 = vld [vmem:[%s3626_s3] sm:$0xff] }
  0x1b   :  { %3125 = vmatprep.subr.bf16.mxu1 %v3124_v46  ;;  %v3152_v13 = vpack.c.bf16 %v692_v12, %v691_v11  ;;  %vm1622_vm3 = vcmp.eq.s32.totalorder %v1620_v39, 0 }
  0x1c   :  { %2889 = vmatmul.mubr.msk.f32.vlgmr.msra.gmra.mrb[4].mxu0 %vm48_vm0, %v356_v49 }
  0x1d   :  { %3119 = vmatpush3.bf16.msra.mxu0 %v3116_v43  ;;  %2900 = vmatmul.mubr.msk.f32.vlgmr.msra.gmra.mrb[4].mxu1 %vm48_vm0, %v356_v49 }
  0x1e   :  { %3121 = vmatprep.subr.bf16.mxu0 %v3120_v50  ;;  %3127 = vmatpush3.bf16.msra.mxu1 %v3124_v46 }
  0x1f   :  { %2910 = vmatprep.mubr.msk.f32.mxu0 %vm48_vm0, %v355_v40  ;;  %3129 = vmatprep.subr.bf16.mxu1 %v3128_v51 }
  0x20   :  { %2921 = vmatprep.mubr.msk.f32.mxu1 %vm48_vm0, %v355_v40  ;;  %v1621_v40 = vld [vmem:[%s3626_s3 + $0x8] sm:$0xff] }
  0x21   :  { %3123 = vmatpush3.bf16.msra.mxu0 %v3120_v50  ;;  %vm1623_vm4 = vcmp.eq.s32.totalorder %v1621_v40, 0 }
  0x22   :  { %3131 = vmatpush3.bf16.msra.mxu1 %v3128_v51  ;;  %3133 = vmatprep.subr.bf16.mxu0 %v3132_v56 }
  0x23   :  { %3141 = vmatprep.subr.bf16.mxu1 %v3140_v57 }
  0x24   :  { %2911 = vmatmul.mubr.msk.f32.vlgmr.msra.gmra.mrb[6].mxu0 %vm48_vm0, %v356_v49 }
  0x25   :  { %2922 = vmatmul.mubr.msk.f32.vlgmr.msra.gmra.mrb[6].mxu1 %vm48_vm0, %v356_v49  ;;  %3135 = vmatpush3.bf16.msra.mxu0 %v3132_v56 }
  0x26   :  { %3143 = vmatpush3.bf16.msra.mxu1 %v3140_v57  ;;  %3137 = vmatprep.subr.bf16.mxu0 %v3136_v63 }
  0x27   :  { %3145 = vmatprep.subr.bf16.mxu1 %v3144_v60  ;;  %2932 = vmatprep.mubr.msk.f32.mxu0 %vm48_vm0, %v679_v2 }
  0x28   :  { %2943 = vmatprep.mubr.msk.f32.mxu1 %vm48_vm0, %v679_v2 }
  0x29   :  { %3139 = vmatpush3.bf16.msra.mxu0 %v3136_v63 }
  0x2a   :  { %3147 = vmatpush3.bf16.msra.mxu1 %v3144_v60  ;;  %3149 = vmatprep.subr.bf16.mxu0 %v3148_v9 }
  0x2b   :  { %3157 = vmatprep.subr.bf16.mxu1 %v3156_v3 }
  0x2c   :  { %2933 = vmatmul.mubr.msk.f32.vlgmr.msra.gmra.mrb[8].mxu0 %vm48_vm0, %v680_v4 }
  0x2d   :  { %2944 = vmatmul.mubr.msk.f32.vlgmr.msra.gmra.mrb[8].mxu1 %vm48_vm0, %v680_v4  ;;  %3151 = vmatpush3.bf16.msra.mxu0 %v3148_v9 }
  0x2e   :  { %3159 = vmatpush3.bf16.msra.mxu1 %v3156_v3  ;;  %2965 = vmatprep.mubr.msk.f32.mxu1 %vm48_vm0, %v679_v2 }
  0x2f   :  { %3161 = vmatprep.subr.bf16.mxu1 %v3160_v10  ;;  %2954 = vmatprep.mubr.msk.f32.mxu0 %vm48_vm0, %v679_v2 }
  0x30   :  { %3153 = vmatprep.subr.bf16.mxu0 %v3152_v13 }
  0x31   :  { %3155 = vmatpush3.bf16.msra.mxu0 %v3152_v13 }
  0x32   :  { %3163 = vmatpush3.bf16.msra.mxu1 %v3160_v10  ;;  %2968 = vmatprep.subr.mxu0 %v3225_v14 }
  0x33   :  { %2973 = vmatprep.subr.mxu1 %v3225_v14 }
  0x34   :  { %2955 = vmatmul.mubr.msk.f32.vlgmr.msra.gmra.mrb[10].mxu0 %vm48_vm0, %v680_v4 }
  0x35   :  { %2966 = vmatmul.mubr.msk.f32.vlgmr.msra.gmra.mrb[10].mxu1 %vm48_vm0, %v680_v4  ;;  %2970 = vmatprep.mubr.msk.f32.mxu0 %vm3226_vm1, %v3225_v14 }
  0x36   :  { %2975 = vmatprep.mubr.msk.f32.mxu1 %vm3226_vm1, %v3225_v14 }
  0xdf   :  { %v2846_v15 = vpop.f32.mrb[0].mxu0 }
  0xe0   :  { %v121_v16 = vpop.f32.mrb[1].mxu0  ;;  %v2857_v17 = vpop.f32.mrb[0].mxu1 }
  0xe1   :  { %v196_v18 = vpop.f32.mrb[1].mxu1 }
  0xe7   :  { %v2868_v19 = vpop.f32.mrb[2].mxu0 }
  0xe8   :  { %v271_v20 = vpop.f32.mrb[3].mxu0  ;;  %v2879_v21 = vpop.f32.mrb[2].mxu1 }
  0xe9   :  { %v346_v22 = vpop.f32.mrb[3].mxu1 }
  0xef   :  { %v2890_v23 = vpop.f32.mrb[4].mxu0 }
  0xf0   :  { %v445_v24 = vpop.f32.mrb[5].mxu0  ;;  %2974 = vmatpush3.xpose.msk.msra.mxu1 %vm1003_vm2, %v2890_v23  ;;  %v2901_v25 = vpop.f32.mrb[4].mxu1 }
  0xf1   :  { %2969 = vmatpush3.xpose.msk.msra.mxu0 %vm1003_vm2, %v445_v24  ;;  %v520_v26 = vpop.f32.mrb[5].mxu1  ;;  %2983 = vmatprep.subr.mxu1 %v3225_v14 }
  0xf2   :  { %2978 = vmatprep.subr.mxu0 %v3225_v14 }
  0xf3   :  { %2976 = vmatmul.mubr.msk.f32.vlgmr.msra.gmra.mrb[12].mxu1 %vm1003_vm2, %v2846_v15 }
  0xf4   :  { %2971 = vmatmul.mubr.msk.f32.vlgmr.msra.gmra.mrb[12].mxu0 %vm1003_vm2, %v121_v16  ;;  %2984 = vmatpush3.xpose.msk.msra.mxu1 %vm1003_vm2, %v2901_v25 }
  0xf5   :  { %2979 = vmatpush3.xpose.msk.msra.mxu0 %vm1003_vm2, %v520_v26  ;;  %2985 = vmatprep.mubr.msk.f32.mxu1 %vm3226_vm1, %v3225_v14 }
  0xf6   :  { %2980 = vmatprep.mubr.msk.f32.mxu0 %vm3226_vm1, %v3225_v14  ;;  %2993 = vmatprep.subr.mxu1 %v3225_v14 }
  0xf7   :  { %v2912_v27 = vpop.f32.mrb[6].mxu0  ;;  %2986 = vmatmul.mubr.msk.f32.vlgmr.msra.gmra.mrb[14].mxu1 %vm1003_vm2, %v2857_v17  ;;  %2988 = vmatprep.subr.mxu0 %v3225_v14 }
  0xf8   :  { %v595_v28 = vpop.f32.mrb[7].mxu0  ;;  %2981 = vmatmul.mubr.msk.f32.vlgmr.msra.gmra.mrb[14].mxu0 %vm1003_vm2, %v196_v18  ;;  %2994 = vmatpush3.xpose.msk.msra.mxu1 %vm1003_vm2, %v2912_v27  ;;  %v2923_v29 = vpop.f32.mrb[6].mxu1 }
  0xf9   :  { %2989 = vmatpush3.xpose.msk.msra.mxu0 %vm1003_vm2, %v595_v28  ;;  %2995 = vmatprep.mubr.msk.f32.mxu1 %vm3226_vm1, %v3225_v14  ;;  %v670_v30 = vpop.f32.mrb[7].mxu1 }
  0xfa   :  { %2990 = vmatprep.mubr.msk.f32.mxu0 %vm3226_vm1, %v3225_v14  ;;  %3003 = vmatprep.subr.mxu1 %v3225_v14 }
  0xfb   :  { %2996 = vmatmul.mubr.msk.f32.vlgmr.msra.gmra.mrb[16].mxu1 %vm1003_vm2, %v2868_v19  ;;  %2998 = vmatprep.subr.mxu0 %v3225_v14 }
  0xfc   :  { %2991 = vmatmul.mubr.msk.f32.vlgmr.msra.gmra.mrb[16].mxu0 %vm1003_vm2, %v271_v20  ;;  %3004 = vmatpush3.xpose.msk.msra.mxu1 %vm1003_vm2, %v2923_v29 }
  0xfd   :  { %2999 = vmatpush3.xpose.msk.msra.mxu0 %vm1003_vm2, %v670_v30  ;;  %3005 = vmatprep.mubr.msk.f32.mxu1 %vm3226_vm1, %v3225_v14 }
  0xfe   :  { %3000 = vmatprep.mubr.msk.f32.mxu0 %vm3226_vm1, %v3225_v14  ;;  %3008 = vmatprep.subr.mxu0 %v3225_v14 }
  0xff   :  { %3006 = vmatmul.mubr.msk.f32.vlgmr.msra.gmra.mrb[18].mxu1 %vm1003_vm2, %v2879_v21  ;;  %3013 = vmatprep.subr.mxu1 %v3225_v14  ;;  %v2934_v32 = vpop.f32.mrb[8].mxu0 }
 0x100   :  { %3001 = vmatmul.mubr.msk.f32.vlgmr.msra.gmra.mrb[18].mxu0 %vm1003_vm2, %v346_v22  ;;  %3015 = vmatprep.mubr.msk.f32.mxu1 %vm3226_vm1, %v3225_v14  ;;  %v3507_v31 = vpop.f32.mrb[8].mxu1  ;;  %v769_v34 = vpop.f32.mrb[9].mxu0 }
 0x101   :  { %3010 = vmatprep.mubr.msk.f32.mxu0 %vm3226_vm1, %v3225_v14  ;;  %v3509_v33 = vpop.f32.mrb[9].mxu1  ;;  %3014 = vmatpush3.msra.mxu1 %v2934_v32 }
 0x102   :  { %3009 = vmatpush3.msra.mxu0 %v769_v34  ;;  %3023 = vmatprep.subr.mxu1 %v3225_v14 }
 0x103   :  { %3018 = vmatprep.subr.mxu0 %v3225_v14 }
 0x107   :  { %v3517_v37 = vpop.f32.mrb[10].mxu0 }
 0x108   :  { %v3513_v35 = vpop.f32.mrb[10].mxu1  ;;  %v3519_v38 = vpop.f32.mrb[11].mxu0 }
 0x109   :  { %v3515_v36 = vpop.f32.mrb[11].mxu1 }
 0x1c6   :  { %v1152_v41 = vpop.f32.mrb[12].mxu1 }
 0x1c7   :  { %v1613_v42 = vmul.f32 0.35355338, %v1152_v41  ;;  %v1076_v43 = vpop.f32.mrb[12].mxu0  ;;  %v2977_v44 = vpop.f32.mrb[13].mxu1 }
 0x1c8   :  { %v1612_v45 = vmul.f32 0.35355338, %v1076_v43  ;;  %v2972_v46 = vpop.f32.mrb[13].mxu0 }
 0x1c9   :  { %v1625_v52 = vsel %vm1623_vm4, -1e+09, %v1613_v42 }
 0x1ca   :  { %v1304_v47 = vpop.f32.mrb[14].mxu1  ;;  %v1624_v48 = vsel %vm1622_vm3, -1e+09, %v1612_v45  ;;  %v1635_v61 = vsel %vm1003_vm2, %v1625_v52, -inf }
 0x1cb   :  { %v1228_v49 = vpop.f32.mrb[14].mxu0  ;;  %v2987_v50 = vpop.f32.mrb[15].mxu1  ;;  %v1632_v51 = vsel %vm1003_vm2, %v1624_v48, -inf  ;;  %v1615_v53 = vmul.f32 0.35355338, %v1304_v47 }
 0x1cc   :  { %v1614_v54 = vmul.f32 0.35355338, %v1228_v49  ;;  %1633 = vmax.xlane.f32.xlu0 %v1632_v51  ;;  %v2982_v55 = vpop.f32.mrb[15].mxu0 }
 0x1cd   :  { %v1627_v1 = vsel %vm1623_vm4, -1e+09, %v1615_v53 }
 0x1ce   :  { %v1456_v56 = vpop.f32.mrb[16].mxu1  ;;  %v1626_v57 = vsel %vm1622_vm3, -1e+09, %v1614_v54  ;;  %v1641_v6 = vsel %vm1003_vm2, %v1627_v1, -inf }
 0x1cf   :  { %v1617_v58 = vmul.f32 0.35355338, %v1456_v56  ;;  %v1380_v59 = vpop.f32.mrb[16].mxu0  ;;  %v2997_v60 = vpop.f32.mrb[17].mxu1  ;;  %v1638_v62 = vsel %vm1003_vm2, %v1626_v57, -inf }
 0x1d0   :  { %v1616_v63 = vmul.f32 0.35355338, %v1380_v59  ;;  %1636 = vmax.xlane.f32.xlu0 %v1635_v61  ;;  %1639 = vmax.xlane.f32.xlu1 %v1638_v62  ;;  %v2992_v0 = vpop.f32.mrb[17].mxu0 }
 0x1d1   :  { %v1629_v8 = vsel %vm1623_vm4, -1e+09, %v1617_v58 }
 0x1d2   :  { %v1608_v2 = vpop.f32.mrb[18].mxu1  ;;  %v1628_v3 = vsel %vm1622_vm3, -1e+09, %v1616_v63  ;;  %v1647_v13 = vsel %vm1003_vm2, %v1629_v8, -inf }
 0x1d3   :  { %v1532_v4 = vpop.f32.mrb[18].mxu0  ;;  %v3007_v5 = vpop.f32.mrb[19].mxu1  ;;  %v1644_v7 = vsel %vm1003_vm2, %v1628_v3, -inf  ;;  %v1619_v9 = vmul.f32 0.35355338, %v1608_v2 }
 0x1d4   :  { %v1618_v10 = vmul.f32 0.35355338, %v1532_v4  ;;  %1642 = vmax.xlane.f32.xlu1 %v1641_v6  ;;  %1645 = vmax.xlane.f32.xlu0 %v1644_v7  ;;  %v3002_v11 = vpop.f32.mrb[19].mxu0 }
 0x1d5   :  { %v1631_v16 = vsel %vm1623_vm4, -1e+09, %v1619_v9 }
 0x1d6   :  { %v1630_v12 = vsel %vm1622_vm3, -1e+09, %v1618_v10  ;;  %v1653_v17 = vsel %vm1003_vm2, %v1631_v16, -inf }
 0x1d7   :  { %v1650_v15 = vsel %vm1003_vm2, %v1630_v12, -inf }
 0x1d8   :  { %1648 = vmax.xlane.f32.xlu1 %v1647_v13  ;;  %1651 = vmax.xlane.f32.xlu0 %v1650_v15 }
 0x1dc   :  { %1654 = vmax.xlane.f32.xlu1 %v1653_v17 }
 0x259   :  { %v1634_v18 = vpop.xlane.xlu0 %1633 }
 0x25a   :  { %v1656_v19 = vsub.f32 %v1624_v48, %v1634_v18 }
 0x25c   :  { %v1664_v20 = vmul.f32 1.442695, %v1656_v19 }
 0x25d   :  { %v1637_v21 = vpop.xlane.xlu0 %1636  ;;  %v1640_v22 = vpop.xlane.xlu1 %1639 }
 0x25e   :  { %3169 = vpow2.f32 %v1664_v20  ;;  %v1657_v23 = vsub.f32 %v1625_v52, %v1637_v21  ;;  %v1658_v24 = vsub.f32 %v1626_v57, %v1640_v22  ;;  %v2305_v21 = vld [vmem:[%s3630_s7 + $0x8] sm:$0xff] }
 0x260   :  { %v1666_v25 = vmul.f32 1.442695, %v1657_v23  ;;  %v1668_v26 = vmul.f32 1.442695, %v1658_v24 }
 0x261   :  { %v1643_v27 = vpop.xlane.xlu1 %1642  ;;  %v1646_v28 = vpop.xlane.xlu0 %1645 }
 0x262   :  { %3171 = vpow2.f32 %v1666_v25  ;;  %v1659_v29 = vsub.f32 %v1627_v1, %v1643_v27  ;;  %v1660_v30 = vsub.f32 %v1628_v3, %v1646_v28 }
 0x263   :  { %3173 = vpow2.f32 %v1668_v26 }
 0x264   :  { %v1670_v32 = vmul.f32 1.442695, %v1659_v29  ;;  %v1672_v34 = vmul.f32 1.442695, %v1660_v30 }
 0x265   :  { %v1649_v39 = vpop.xlane.xlu1 %1648  ;;  %v1652_v40 = vpop.xlane.xlu0 %1651 }
 0x266   :  { %3175 = vpow2.f32 %v1670_v32  ;;  %v1661_v41 = vsub.f32 %v1629_v8, %v1649_v39  ;;  %v1662_v42 = vsub.f32 %v1630_v12, %v1652_v40 }
 0x267   :  { %3177 = vpow2.f32 %v1672_v34 }
 0x268   :  { %v3170_v43 = vpop.eup %3169  ;;  %v1674_v44 = vmul.f32 1.442695, %v1661_v41  ;;  %v1676_v45 = vmul.f32 1.442695, %v1662_v42 }
 0x269   :  { %v1655_v46 = vpop.xlane.xlu1 %1654  ;;  %v1680_v47 = vsel %vm1003_vm2, %v3170_v43, 0.0 }
 0x26a   :  { %3179 = vpow2.f32 %v1674_v44  ;;  %v1663_v48 = vsub.f32 %v1631_v16, %v1655_v46  ;;  %1681 = vadd.xlane.f32.xlu0 %v1680_v47 }
 0x26b   :  { %3181 = vpow2.f32 %v1676_v45 }
 0x26c   :  { %v3172_v49 = vpop.eup %3171  ;;  %v1678_v50 = vmul.f32 1.442695, %v1663_v48 }
 0x26d   :  { %v3174_v51 = vpop.eup %3173  ;;  %v1683_v52 = vsel %vm1003_vm2, %v3172_v49, 0.0 }
 0x26e   :  { %3183 = vpow2.f32 %v1678_v50  ;;  %1684 = vadd.xlane.f32.xlu1 %v1683_v52  ;;  %v1686_v53 = vsel %vm1003_vm2, %v3174_v51, 0.0 }
 0x26f   :  { %1687 = vadd.xlane.f32.xlu0 %v1686_v53 }
 0x270   :  { %v3176_v54 = vpop.eup %3175 }
 0x271   :  { %v3178_v55 = vpop.eup %3177  ;;  %v1689_v56 = vsel %vm1003_vm2, %v3176_v54, 0.0 }
 0x272   :  { %1690 = vadd.xlane.f32.xlu1 %v1689_v56  ;;  %v1692_v57 = vsel %vm1003_vm2, %v3178_v55, 0.0 }
 0x273   :  { %1693 = vadd.xlane.f32.xlu0 %v1692_v57 }
 0x274   :  { %v3180_v58 = vpop.eup %3179 }
 0x275   :  { %v3182_v59 = vpop.eup %3181  ;;  %v1695_v60 = vsel %vm1003_vm2, %v3180_v58, 0.0 }
 0x276   :  { %1696 = vadd.xlane.f32.xlu1 %v1695_v60  ;;  %v1698_v61 = vsel %vm1003_vm2, %v3182_v59, 0.0 }
 0x277   :  { %1699 = vadd.xlane.f32.xlu0 %v1698_v61 }
 0x278   :  { %v3184_v62 = vpop.eup %3183 }
 0x279   :  { %v1701_v63 = vsel %vm1003_vm2, %v3184_v62, 0.0 }
 0x27a   :  { %1702 = vadd.xlane.f32.xlu1 %v1701_v63 }
 0x2f7   :  { %v1682_v0 = vpop.xlane.xlu0 %1681 }
 0x2f8   :  { %3185 = vrcp.f32 %v1682_v0 }
 0x2fb   :  { %v1685_v1 = vpop.xlane.xlu1 %1684 }
 0x2fc   :  { %3187 = vrcp.f32 %v1685_v1  ;;  %v1688_v2 = vpop.xlane.xlu0 %1687 }
 0x2fd   :  { %3189 = vrcp.f32 %v1688_v2 }
 0x2ff   :  { %v1691_v3 = vpop.xlane.xlu1 %1690 }
 0x300   :  { %3191 = vrcp.f32 %v1691_v3  ;;  %v1694_v4 = vpop.xlane.xlu0 %1693 }
 0x301   :  { %3193 = vrcp.f32 %v1694_v4 }
 0x302   :  { %v3186_v5 = vpop.eup %3185 }
 0x303   :  { %v1705_v6 = vmul.f32 %v3186_v5, %v3170_v43  ;;  %v1697_v7 = vpop.xlane.xlu1 %1696 }
 0x304   :  { %3195 = vrcp.f32 %v1697_v7  ;;  %v1700_v8 = vpop.xlane.xlu0 %1699 }
 0x305   :  { %3197 = vrcp.f32 %v1700_v8  ;;  %3011 = vmatmul.mubr.msk.f32.vlgmr.msra.gmra.mrb[20].mxu0 %vm1003_vm2, %v1705_v6 }
 0x306   :  { %v3188_v9 = vpop.eup %3187  ;;  %3019 = vmatpush3.msra.mxu0 %v3509_v33  ;;  %3020 = vmatprep.mubr.msk.f32.mxu0 %vm3226_vm1, %v3225_v14 }
 0x307   :  { %v3190_v10 = vpop.eup %3189  ;;  %v1707_v11 = vmul.f32 %v3188_v9, %v3172_v49  ;;  %v1703_v12 = vpop.xlane.xlu1 %1702  ;;  %3028 = vmatprep.subr.mxu0 %v3225_v14 }
 0x308   :  { %v1709_v13 = vmul.f32 %v3190_v10, %v3174_v51  ;;  %3199 = vrcp.f32 %v1703_v12 }
 0x309   :  { %3016 = vmatmul.mubr.msk.f32.vlgmr.msra.gmra.mrb[20].mxu1 %vm1003_vm2, %v1707_v11 }
 0x30a   :  { %v3192_v15 = vpop.eup %3191  ;;  %3021 = vmatmul.mubr.msk.f32.vlgmr.msra.gmra.mrb[22].mxu0 %vm1003_vm2, %v1709_v13  ;;  %3024 = vmatpush3.msra.mxu1 %v3507_v31 }
 0x30b   :  { %v3194_v16 = vpop.eup %3193  ;;  %v1711_v17 = vmul.f32 %v3192_v15, %v3176_v54  ;;  %3029 = vmatpush3.msra.mxu0 %v3519_v38  ;;  %3025 = vmatprep.mubr.msk.f32.mxu1 %vm3226_vm1, %v3225_v14 }
 0x30c   :  { %v1713_v33 = vmul.f32 %v3194_v16, %v3178_v55  ;;  %3030 = vmatprep.mubr.msk.f32.mxu0 %vm3226_vm1, %v3225_v14  ;;  %3033 = vmatprep.subr.mxu1 %v3225_v14 }
 0x30d   :  { %3038 = vmatprep.subr.mxu0 %v3225_v14  ;;  %3026 = vmatmul.mubr.msk.f32.vlgmr.msra.gmra.mrb[22].mxu1 %vm1003_vm2, %v1711_v17 }
 0x30e   :  { %v3196_v18 = vpop.eup %3195  ;;  %3031 = vmatmul.mubr.msk.f32.vlgmr.msra.gmra.mrb[24].mxu0 %vm1003_vm2, %v1713_v33  ;;  %3034 = vmatpush3.msra.mxu1 %v3517_v37 }
 0x30f   :  { %v3198_v31 = vpop.eup %3197  ;;  %v1715_v38 = vmul.f32 %v3196_v18, %v3180_v58  ;;  %3039 = vmatpush3.msra.mxu0 %v3515_v36  ;;  %3035 = vmatprep.mubr.msk.f32.mxu1 %vm3226_vm1, %v3225_v14  ;;  %v2304_v36 = vld [vmem:[%s3630_s7] sm:$0xff] }
 0x310   :  { %v1717_v19 = vmul.f32 %v3198_v31, %v3182_v59  ;;  %3040 = vmatprep.mubr.msk.f32.mxu0 %vm3226_vm1, %v3225_v14  ;;  %3043 = vmatprep.subr.mxu1 %v3225_v14 }
 0x311   :  { %3036 = vmatmul.mubr.msk.f32.vlgmr.msra.gmra.mrb[24].mxu1 %vm1003_vm2, %v1715_v38  ;;  %3048 = vmatprep.subr.mxu0 %v2304_v36 }
 0x312   :  { %v3200_v20 = vpop.eup %3199  ;;  %3041 = vmatmul.mubr.msk.f32.vlgmr.msra.gmra.mrb[26].mxu0 %vm1003_vm2, %v1717_v19  ;;  %3044 = vmatpush3.msra.mxu1 %v3513_v35  ;;  %v2306_v35 = vld [vmem:[%s3630_s7 + $0x10] sm:$0xff] }
 0x313   :  { %v1719_v37 = vmul.f32 %v3200_v20, %v3184_v62  ;;  %3045 = vmatprep.mubr.msk.f32.mxu1 %vm3226_vm1, %v3225_v14  ;;  %3049 = vmatpush3.msra.mxu0 %v2304_v36  ;;  %v2307_v14 = vld [vmem:[%s3630_s7 + $0x18] sm:$0xff]  ;;  %s3227_s7 = smov [#allocation2]  }
 0x314   :  { %3053 = vmatprep.subr.mxu1 %v2305_v21  ;;  %3058 = vmatprep.subr.mxu0 %v2306_v35  ;;  %s2653_s23 = sshll.u32 %s3227_s7, 4  ;;  %s2654_s23 = int_to_ptr.vmem [resolvable:$true] %s2653_s23 }
 0x315   :  { %3046 = vmatmul.mubr.msk.f32.vlgmr.msra.gmra.mrb[26].mxu1 %vm1003_vm2, %v1719_v37  ;;  %s3201_s0 = scalar_lea.vmem %s2654_s23, 256  ;;  %p3206_p1 = scmp.lt.s32.totalorder %s2654_s23, %s2654_s23 }
 0x316   :  { %3054 = vmatpush3.msra.mxu1 %v2305_v21  ;;  %p3202_p0 = scmp.ne.s32.totalorder %s2654_s23, %s3201_s0  ;;  %p3207_p2 = scmp.lt.s32.totalorder %s3201_s0, %s3201_s0 }
 0x317   :  { %3063 = vmatprep.subr.mxu1 %v2307_v14 }
 0x318   :  { %p3208_p3 = por %p3207_p2, %p3206_p1 }
 0x31a   :  { %p3209_p4 = pnand %p3208_p3, %p3202_p0 }
 0x3d8   :  { %v1789_v22 = vpop.f32.mrb[20].mxu0 }
 0x3d9   :  { %v3012_v23 = vpop.f32.mrb[21].mxu0  ;;  %3050 = vmatprep.mubr.msk.f32.mxu0 %vm1003_vm2, %v1789_v22 }
 0x3dc   :  { %v1862_v24 = vpop.f32.mrb[20].mxu1 }
 0x3dd   :  { %v1935_v25 = vpop.f32.mrb[22].mxu0  ;;  %v3017_v26 = vpop.f32.mrb[21].mxu1  ;;  %3051 = vmatmul.mubr.msk.f32.vlgmr.msra.gmra.mrb[28].mxu0 %vm1003_vm2, %v1862_v24 }
 0x3de   :  { %v3022_v27 = vpop.f32.mrb[23].mxu0  ;;  %3055 = vmatprep.mubr.msk.f32.mxu1 %vm1003_vm2, %v1935_v25  ;;  %3059 = vmatpush3.msra.mxu0 %v2306_v35 }
 0x3e0   :  { %v2008_v28 = vpop.f32.mrb[22].mxu1 }
 0x3e1   :  { %v2081_v29 = vpop.f32.mrb[24].mxu0  ;;  %v3027_v30 = vpop.f32.mrb[23].mxu1  ;;  %3056 = vmatmul.mubr.msk.f32.vlgmr.msra.gmra.mrb[28].mxu1 %vm1003_vm2, %v2008_v28 }
 0x3e2   :  { %v3032_v32 = vpop.f32.mrb[25].mxu0  ;;  %3060 = vmatprep.mubr.msk.f32.mxu0 %vm1003_vm2, %v2081_v29  ;;  %3064 = vmatpush3.msra.mxu1 %v2307_v14 }
 0x3e4   :  { %v2154_v34 = vpop.f32.mrb[24].mxu1 }
 0x3e5   :  { %v2227_v39 = vpop.f32.mrb[26].mxu0  ;;  %v3037_v40 = vpop.f32.mrb[25].mxu1  ;;  %3061 = vmatmul.mubr.msk.f32.vlgmr.msra.gmra.mrb[30].mxu0 %vm1003_vm2, %v2154_v34 }
 0x3e6   :  { %v3042_v41 = vpop.f32.mrb[27].mxu0  ;;  %3065 = vmatprep.mubr.msk.f32.mxu1 %vm1003_vm2, %v2227_v39 }
 0x3e8   :  { %v2300_v42 = vpop.f32.mrb[26].mxu1 }
 0x3e9   :  { %v3047_v43 = vpop.f32.mrb[27].mxu1  ;;  %3066 = vmatmul.mubr.msk.f32.vlgmr.msra.gmra.mrb[30].mxu1 %vm1003_vm2, %v2300_v42 }
 0x4b0   :  { %v3052_v44 = vpop.f32.mrb[28].mxu0 }
 0x4b1   :  { %v2380_v45 = vpop.f32.mrb[29].mxu0  ;;  %v2639_v47 = vsel %vm48_vm0, %v3052_v44, 0.0 }
 0x4b2   :  { %v2632_v50 = vsel %vm48_vm0, %v2380_v45, 0.0 }
 0x4b4   :  { %v3057_v46 = vpop.f32.mrb[28].mxu1 }
 0x4b5   :  { %v2640_v48 = vsel %vm48_vm0, %v3057_v46, 0.0  ;;  %v2461_v49 = vpop.f32.mrb[29].mxu1 }
 0x4b6   :  { %v2641_v51 = vadd.f32 %v2640_v48, %v2639_v47  ;;  %v2633_v52 = vsel %vm48_vm0, %v2461_v49, 0.0 }
 0x4b7   :  { %v2634_v53 = vadd.f32 %v2633_v52, %v2632_v50 }
 0x4b8   :  { %v3062_v54 = vpop.f32.mrb[30].mxu0 }
 0x4b9   :  { %v2642_v55 = vsel %vm48_vm0, %v3062_v54, 0.0  ;;  %v2542_v56 = vpop.f32.mrb[31].mxu0 }
 0x4ba   :  { %v2643_v57 = vadd.f32 %v2642_v55, %v2641_v51  ;;  %v2635_v58 = vsel %vm48_vm0, %v2542_v56, 0.0 }
 0x4bb   :  { %v2636_v59 = vadd.f32 %v2635_v58, %v2634_v53 }
 0x4bc   :  { %v3067_v60 = vpop.f32.mrb[30].mxu1 }
 0x4bd   :  { %v2644_v61 = vsel %vm48_vm0, %v3067_v60, 0.0  ;;  %v2623_v62 = vpop.f32.mrb[31].mxu1 }
 0x4be   :  { %v2645_v63 = vadd.f32 %v2644_v61, %v2643_v57  ;;  %v2637_v0 = vsel %vm48_vm0, %v2623_v62, 0.0 }
 0x4bf   :  { %v2638_v1 = vadd.f32 %v2637_v0, %v2636_v59 }
 0x4c0   :  { %2647 = vst.msk [vmem:[#allocation2 + $0x8] sm:$0xff] %vm48_vm0, %v2645_v63 }
 0x4c1   :  { %2646 = vst.msk [vmem:[#allocation2] sm:$0xff] %vm48_vm0, %v2638_v1 }
 0x4c2   :  { %3212 = shalt.err (!%p3209_p4)
}
 0x4c3   :  { %s3213_s26 = scalar_lea.hbm %s3631_s8, 256 }
 0x4c4   :  { %p3214_p5 = scmp.ne.s32.totalorder %s3631_s8, %s3213_s26  ;;  %p3217_p6 = scmp.lt.u32.totalorder %s3213_s26, %s3631_s8 }
 0x4c6   :  { %p3219_p7 = pnand %p3217_p6, %p3214_p5 }
 0x4c8   :  { %3222 = shalt.err (!%p3219_p7)
}
 0x4c9   :  { %s3228_s9 = smov 128   ;;  %s3229_s10 = smov 8  }
 0x4ca   :  { %2659 = dma.vmem_to_hbm [thread:$0]  %s2654_s23, 256, %s3631_s8, [#allocation3], %s3228_s9, %s3228_s9, %s3229_s10  }
 0x4cb   :  { %3223 = dma.done.wait [#allocation3], 256  }
 0x4cc   :  { %3224 = vsyncadd [#allocation3], 4294967040 }
 0x4cd   :  { %2663 = vsyncpa [#allocation3], 1 }

</bundles_post_ra>
